<compile_context>
chip_gen: v7x
topology: tpu7x:2x2x1
jax: 0.10.0
libtpu: 0.0.40
codegen_flags: <defaults>
</compile_context>

<pallas_src>
import math

import jax
import jax.numpy as jnp
from jax import lax
from jax.experimental import pallas as pl
from jax.experimental.pallas import tpu as pltpu


def _round_up(a: int, b: int) -> int:
    return (a + b - 1) // b * b


def _pick_tile_n(n: int, target: int = 512) -> int:
    """Row-tile size: multiple of 8 (sublane), capped at `target`."""
    if n <= target:
        return _round_up(max(n, 8), 8)
    return target  # 512 is a multiple of 8


def _pack_factor(d: int) -> int:
    """How many length-D rows fit in one 128-lane row (1 if D doesn't pack evenly)."""
    if d < 128 and 128 % d == 0:
        return 128 // d
    return 1


# ---------------------------------------------------------------------------
# Kernel 1: gram matrix  G_big = x_r^T x_r  (accumulated over row tiles)
# ---------------------------------------------------------------------------
def _gram_kernel(x_ref, g_ref, acc_ref):
    k = pl.program_id(0)

    @pl.when(k == 0)
    def _():
        acc_ref[...] = jnp.zeros_like(acc_ref)

    x = x_ref[...]  # (TN, DP) fp32
    acc_ref[...] += lax.dot_general(
        x, x,
        dimension_numbers=(((0,), (0,)), ((), ())),  # contract over rows -> (DP, DP)
        preferred_element_type=jnp.float32,
    )

    @pl.when(k == pl.num_programs(0) - 1)
    def _():
        g_ref[...] = acc_ref[...]


# ---------------------------------------------------------------------------
# Kernel 2: projection  out = x_r @ W_big   (W_big = blockdiag(W) * sqrt(units))
# ---------------------------------------------------------------------------
def _proj_kernel(x_ref, w_ref, o_ref):
    o_ref[...] = jnp.dot(x_ref[...], w_ref[...],
                         preferred_element_type=jnp.float32)


def _gram(x_r: jax.Array) -> jax.Array:
    """x_r: (Nr, DP) fp32 -> (DP, DP) fp32 = x_r^T x_r."""
    n, dp = x_r.shape
    tn = _pick_tile_n(n)
    n_pad = _round_up(n, tn)
    if n_pad != n:
        x_r = jnp.pad(x_r, ((0, n_pad - n), (0, 0)))  # zero rows contribute 0
    grid = (n_pad // tn,)

    return pl.pallas_call(
        _gram_kernel,
        out_shape=jax.ShapeDtypeStruct((dp, dp), jnp.float32),
        grid=grid,
        in_specs=[pl.BlockSpec((tn, dp), lambda k: (k, 0))],
        out_specs=pl.BlockSpec((dp, dp), lambda k: (0, 0)),   # resident output across grid
        scratch_shapes=[pltpu.VMEM((dp, dp), jnp.float32)],
        compiler_params=pltpu.CompilerParams(
            dimension_semantics=("arbitrary",),               # N is a reduction axis
        ),
        cost_estimate=pl.CostEstimate(
            flops=2 * n_pad * dp * dp,
            transcendentals=0,
            bytes_accessed=n_pad * dp * 4 + dp * dp * 4,
        ),
    )(x_r)


def _project(x_r: jax.Array, w_big: jax.Array) -> jax.Array:
    """x_r: (Nr, DP), w_big: (DP, DP) -> (Nr, DP) = x_r @ w_big."""
    n, dp = x_r.shape
    tn = _pick_tile_n(n)
    n_pad = _round_up(n, tn)
    if n_pad != n:
        x_r = jnp.pad(x_r, ((0, n_pad - n), (0, 0)))
    grid = (n_pad // tn,)

    out = pl.pallas_call(
        _proj_kernel,
        out_shape=jax.ShapeDtypeStruct((n_pad, dp), jnp.float32),
        grid=grid,
        in_specs=[
            pl.BlockSpec((tn, dp), lambda k: (k, 0)),
            pl.BlockSpec((dp, dp), lambda k: (0, 0)),          # W resident across the grid
        ],
        out_specs=pl.BlockSpec((tn, dp), lambda k: (k, 0)),
        compiler_params=pltpu.CompilerParams(
            dimension_semantics=("parallel",),                 # rows independent -> megacore
        ),
        cost_estimate=pl.CostEstimate(
            flops=2 * n_pad * dp * dp,
            transcendentals=0,
            bytes_accessed=2 * n_pad * dp * 4 + dp * dp * 4,
        ),
    )(x_r, w_big)
    return out[:n] if n_pad != n else out


def orthonorm(x: jax.Array, units: int, epsilon: float = 1e-6) -> jax.Array:
    """Forward pass of the Orthonorm module. x: (N, units) fp32."""
    x = x.astype(jnp.float32)
    n, d = x.shape
    p = _pack_factor(d)
    dp = p * d

    # Lane-pack: pad rows to a multiple of p, reshape (N, D) -> (N/p, p*D) (contiguous -> free).
    n_p = _round_up(n, p)
    x_pad = jnp.pad(x, ((0, n_p - n), (0, 0))) if n_p != n else x
    x_r = x_pad.reshape(n_p // p, dp)

    # Pallas: tiled, accumulated "big" gram; reduce its p diagonal (D, D) blocks to G = x^T x.
    g_big = _gram(x_r)                                         # (dp, dp)
    if p > 1:
        g = jnp.einsum("pipj->ij", g_big.reshape(p, d, p, d))  # sum of diagonal blocks
    else:
        g = g_big
    g = g + epsilon * jnp.eye(d, dtype=jnp.float32)            # eps*I hoisted off the hot path

    # TODO(synk): Cholesky / triangular inverse of the small (D, D) matrix has no clean
    # Pallas TPU primitive; done in plain JAX (stays on-device).
    L = jnp.linalg.cholesky(g)
    eye_d = jnp.eye(d, dtype=jnp.float32)
    L_inv = jax.scipy.linalg.solve_triangular(L, eye_d, lower=True)
    w = L_inv.T * jnp.float32(math.sqrt(float(units)))         # fold sqrt(units) into W

    # Block-diagonal W so the lane-packed projection is an exact x @ W per packed slot.
    w_big = jnp.kron(jnp.eye(p, dtype=jnp.float32), w) if p > 1 else w

    out_r = _project(x_r, w_big)                               # Pallas: streaming x_r @ W_big
    out = out_r.reshape(n_p, d)
    return out[:n] if n_p != n else out


def _reference(x: jax.Array, units: int, epsilon: float = 1e-6) -> jax.Array:
    x = x.astype(jnp.float32)
    g = x.T @ x + jnp.eye(x.shape[1], dtype=jnp.float32) * epsilon
    L = jnp.linalg.cholesky(g)
    w = jnp.linalg.inv(L).T * jnp.sqrt(jnp.float32(units))
    return x @ w


if __name__ == "__main__":
    key = jax.random.PRNGKey(0)
    UNITS = 32

    # N=64   : single tile.
    # N=600  : row padding (600 packed rows -> 150, padded to 152 sublaned rows).
    # N=2100 : multi-tile gram reduction + parallel projection grid + zero-row padding.
    for i, N in enumerate((64, 600, 2100)):
        k = jax.random.fold_in(key, i)
        x = jax.random.normal(k, (N, UNITS), dtype=jnp.float32)
        out = jax.block_until_ready(orthonorm(x, UNITS))
        ref = jax.block_until_ready(_reference(x, UNITS))
        assert out.shape == (N, UNITS)
        assert jnp.allclose(out, ref, atol=2e-3, rtol=2e-3), f"mismatch vs reference (N={N})"
        if i == 0:
            gram_out = out.T @ out / UNITS
            assert jnp.allclose(gram_out, jnp.eye(UNITS), atol=1e-2), "output not orthonormal"

    print("KERNEL_OK")
</pallas_src>

<mosaic_0001>
module attributes {stable_mosaic.version = 11 : i64} {
  func.func @_gram_kernel(%arg0: i32, %arg1: memref<16x128xf32, #tpu.memory_space<vmem>>, %arg2: memref<128x128xf32, #tpu.memory_space<vmem>>, %arg3: memref<128x128xf32, #tpu.memory_space<vmem>>) attributes {dimension_semantics = [#tpu.dimension_semantics<arbitrary>], iteration_bounds = array<i64: 1>, scalar_prefetch = 0 : i64, scratch_operands = 1 : i64, tpu.core_type = #tpu.core_type<tc>, window_params = [{transform_indices = @transform_0, window_bounds = array<i64: 16, 128>}, {pipeline_mode = #tpu.pipeline_mode<synchronous>, transform_indices = @transform_1, window_bounds = array<i64: 128, 128>}]} {
    %c0_i32 = arith.constant 0 : i32
    %0 = arith.cmpi eq, %arg0, %c0_i32 : i32
    %1 = arith.extui %0 : i1 to i32
    %c0_i32_0 = arith.constant 0 : i32
    %2 = arith.cmpi ne, %1, %c0_i32_0 : i32
    scf.if %2 {
      %cst_8 = arith.constant 0.000000e+00 : f32
      %11 = vector.broadcast %cst_8 : f32 to vector<128x128xf32>
      %c0_9 = arith.constant 0 : index
      %c0_10 = arith.constant 0 : index
      %12 = vector.load %arg3[%c0_9, %c0_10] : memref<128x128xf32, #tpu.memory_space<vmem>>, vector<128x128xf32>
      tpu.vector_store %arg3[%c0_9, %c0_10], %11 {strides = array<i32>} : memref<128x128xf32, #tpu.memory_space<vmem>>, vector<128x128xf32>,
    } else {
    }
    %c0 = arith.constant 0 : index
    %c0_1 = arith.constant 0 : index
    %3 = vector.load %arg1[%c0, %c0_1] : memref<16x128xf32, #tpu.memory_space<vmem>>, vector<16x128xf32>
    %c0_2 = arith.constant 0 : index
    %c0_3 = arith.constant 0 : index
    %4 = vector.load %arg3[%c0_2, %c0_3] : memref<128x128xf32, #tpu.memory_space<vmem>>, vector<128x128xf32>
    %cst = arith.constant dense<0.000000e+00> : vector<128x128xf32>
    %5 = tpu.matmul %3, %3, %cst {dimension_numbers = #tpu.dot_dimension_numbers<[0], [0], [1], [1], [0, 1, 1, 1], [], []>} : vector<16x128xf32>, vector<16x128xf32>, vector<128x128xf32> -> vector<128x128xf32>
    %6 = arith.addf %4, %5 : vector<128x128xf32>
    %c0_4 = arith.constant 0 : index
    %c0_5 = arith.constant 0 : index
    %7 = vector.load %arg3[%c0_4, %c0_5] : memref<128x128xf32, #tpu.memory_space<vmem>>, vector<128x128xf32>
    tpu.vector_store %arg3[%c0_4, %c0_5], %6 {strides = array<i32>} : memref<128x128xf32, #tpu.memory_space<vmem>>, vector<128x128xf32>,
    %c0_i32_6 = arith.constant 0 : i32
    %8 = arith.cmpi eq, %arg0, %c0_i32_6 : i32
    %9 = arith.extui %8 : i1 to i32
    %c0_i32_7 = arith.constant 0 : i32
    %10 = arith.cmpi ne, %9, %c0_i32_7 : i32
    scf.if %10 {
      %c0_8 = arith.constant 0 : index
      %c0_9 = arith.constant 0 : index
      %11 = vector.load %arg3[%c0_8, %c0_9] : memref<128x128xf32, #tpu.memory_space<vmem>>, vector<128x128xf32>
      %c0_10 = arith.constant 0 : index
      %c0_11 = arith.constant 0 : index
      %12 = vector.load %arg2[%c0_10, %c0_11] : memref<128x128xf32, #tpu.memory_space<vmem>>, vector<128x128xf32>
      tpu.vector_store %arg2[%c0_10, %c0_11], %11 {strides = array<i32>} : memref<128x128xf32, #tpu.memory_space<vmem>>, vector<128x128xf32>,
    } else {
    }
    return
  }
  func.func @transform_0(%arg0: i32) -> (i32, i32) {
    %c0_i32 = arith.constant 0 : i32
    %c0_i32_0 = arith.constant 0 : i32
    return %arg0, %c0_i32 : i32, i32
  }
  func.func @transform_1(%arg0: i32) -> (i32, i32) {
    %c0_i32 = arith.constant 0 : i32
    %c0_i32_0 = arith.constant 0 : i32
    %c0_i32_1 = arith.constant 0 : i32
    return %c0_i32, %c0_i32_0 : i32, i32
  }
}

</mosaic_0001>

<bundles_post_ra>
// kernel: tpu_custom_call.1
= control target key start
LH: loop header
LB: loop body
LE: loop exit
PB: predicated region body
PF: predicated region fallthrough
CT: control target
= control target key end

     0   :  { %6 = vsyncpa [#allocation4], 0  ;;  %s552_s0 = inlined_call_operand.hbm [shape: f32[16,128], index: 0, kind: input, shape index: {}]   ;;  %s553_s1 = inlined_call_operand.hbm [shape: f32[128,128], index: 1, kind: output, shape index: {}]  }
   0x1   :  { %7 = vsyncpa [#allocation5], 0  ;;  %s492_s6 = smov [#allocation3]   ;;  %s444_s10 = scalar_lea.hbm %s552_s0, 256 }
   0x2   :  { %s13_s7 = sshll.u32 %s492_s6, 4  ;;  %p445_p0 = scmp.ne.s32.totalorder %s552_s0, %s444_s10  ;;  %s14_s7 = int_to_ptr.vmem [resolvable:$true] %s13_s7 }
   0x3   :  { %p448_p1 = scmp.lt.u32.totalorder %s444_s10, %s552_s0 }
   0x5   :  { %p450_p2 = pnand %p448_p1, %p445_p0 }
   0x7   :  { %453 = shalt.err (!%p450_p2)
}
   0x8   :  { %s454_s15 = scalar_lea.vmem %s14_s7, 256  ;;  %p459_p4 = scmp.lt.s32.totalorder %s14_s7, %s14_s7 }
   0x9   :  { %p455_p3 = scmp.ne.s32.totalorder %s14_s7, %s454_s15  ;;  %p460_p5 = scmp.lt.s32.totalorder %s454_s15, %s454_s15 }
   0xb   :  { %p461_p6 = por %p460_p5, %p459_p4 }
   0xd   :  { %p462_p7 = pnand %p461_p6, %p455_p3 }
   0xf   :  { %465 = shalt.err (!%p462_p7)
}
  0x10   :  { %s493_s16 = smov 128   ;;  %s494_s17 = smov 8  }
  0x11   :  { %19 = dma.hbm_to_vmem [thread:$0]  %s552_s0, 256, %s14_s7, [#allocation4], %s493_s16, %s493_s16, %s494_s17  }
  0x12   :  { %488 = dma.done.wait [#allocation4], 256  }
  0x13   :  { %489 = vsyncadd [#allocation4], 4294967040  ;;  %v43_v0 = vld [vmem:[#allocation3] sm:$0xff]  ;;  %v44_v1 = vld [vmem:[#allocation3 + $0x8] sm:$0xff]  ;;  %vm93_vm0 = vcmask 130048   ;;  %s495_s0 = smov [#allocation6]  }
  0x14   :  { %61 = vxpose.xlu0.b32.start [1/2] (short) %v43_v0, 128  ;;  %v433_v2 = vpack.c.bf16 %v44_v1, %v43_v0  ;;  %s359_s20 = sshll.u32 %s495_s0, 4  ;;  %s360_s20 = int_to_ptr.vmem [resolvable:$true] %s359_s20 }
  0x15   :  { %s466_s21 = scalar_lea.vmem %s360_s20, 2048  ;;  %p471_p9 = scmp.lt.s32.totalorder %s360_s20, %s360_s20 }
  0x16   :  { %434 = vmatprep.subr.bf16.mxu0 %v433_v2  ;;  %437 = vmatprep.subr.bf16.mxu1 %v433_v2  ;;  %p467_p8 = scmp.ne.s32.totalorder %s360_s20, %s466_s21  ;;  %p472_p10 = scmp.lt.s32.totalorder %s466_s21, %s466_s21 }
  0x17   :  { %436 = vmatpush3.bf16.msra.mxu0 %v433_v2  ;;  %438 = vmatpush3.bf16.msra.mxu1 %v433_v2 }
  0x18   :  { %62 = vxpose.xlu0.b32.end [2/2] (short) %v44_v1, 128  ;;  %p473_p11 = por %p472_p10, %p471_p9 }
  0x1a   :  { %p474_p12 = pnand %p473_p11, %p467_p8 }
  0x94   :  { %v77_v3 = vpop.trf.xlu0 }
  0x95   :  { %409 = vmatprep.mubr.msk.f32.mxu0 %vm93_vm0, %v77_v3 }
  0x98   :  { %v78_v4 = vpop.trf.xlu0 }
  0x99   :  { %410 = vmatmul.mubr.msk.f32.vlgmr.msra.gmra.mrb[0].mxu0 %vm93_vm0, %v78_v4 }
  0x9c   :  { %v79_v5 = vpop.trf.xlu0 }
  0x9d   :  { %412 = vmatprep.mubr.msk.f32.mxu0 %vm93_vm0, %v79_v5 }
  0xa0   :  { %v80_v6 = vpop.trf.xlu0 }
  0xa1   :  { %413 = vmatmul.mubr.msk.f32.gmra.mrb[2].mxu0 %vm93_vm0, %v80_v6 }
  0xa4   :  { %v81_v7 = vpop.trf.xlu0 }
  0xa5   :  { %415 = vmatprep.mubr.msk.f32.mxu0 %vm93_vm0, %v81_v7 }
  0xa8   :  { %v82_v8 = vpop.trf.xlu0 }
  0xa9   :  { %416 = vmatmul.mubr.msk.f32.gmra.mrb[4].mxu0 %vm93_vm0, %v82_v8 }
  0xac   :  { %v83_v9 = vpop.trf.xlu0 }
  0xad   :  { %418 = vmatprep.mubr.msk.f32.mxu0 %vm93_vm0, %v83_v9 }
  0xb0   :  { %v84_v10 = vpop.trf.xlu0 }
  0xb1   :  { %419 = vmatmul.mubr.msk.f32.gmra.mrb[6].mxu0 %vm93_vm0, %v84_v10 }
  0xb4   :  { %v85_v11 = vpop.trf.xlu0 }
  0xb5   :  { %421 = vmatprep.mubr.msk.f32.mxu1 %vm93_vm0, %v85_v11 }
  0xb8   :  { %v86_v12 = vpop.trf.xlu0 }
  0xb9   :  { %422 = vmatmul.mubr.msk.f32.vlgmr.msra.gmra.mrb[0].mxu1 %vm93_vm0, %v86_v12 }
  0xbc   :  { %v87_v13 = vpop.trf.xlu0 }
  0xbd   :  { %424 = vmatprep.mubr.msk.f32.mxu1 %vm93_vm0, %v87_v13 }
  0xc0   :  { %v88_v14 = vpop.trf.xlu0 }
  0xc1   :  { %425 = vmatmul.mubr.msk.f32.gmra.mrb[2].mxu1 %vm93_vm0, %v88_v14 }
  0xc4   :  { %v89_v15 = vpop.trf.xlu0 }
  0xc5   :  { %427 = vmatprep.mubr.msk.f32.mxu1 %vm93_vm0, %v89_v15 }
  0xc8   :  { %v90_v16 = vpop.trf.xlu0 }
  0xc9   :  { %428 = vmatmul.mubr.msk.f32.gmra.mrb[4].mxu1 %vm93_vm0, %v90_v16 }
  0xcc   :  { %v91_v17 = vpop.trf.xlu0 }
  0xcd   :  { %430 = vmatprep.mubr.msk.f32.mxu1 %vm93_vm0, %v91_v17 }
  0xd0   :  { %v92_v18 = vpop.trf.xlu0 }
  0xd1   :  { %431 = vmatmul.mubr.msk.f32.gmra.mrb[6].mxu1 %vm93_vm0, %v92_v18 }
 0x16c   :  { %v411_v19 = vpop.f32.mrb[0].mxu0 }
 0x16d   :  { %339 = vst [vmem:[#allocation6 + $0x8] sm:$0xff] %v411_v19  ;;  %v208_v20 = vpop.f32.mrb[1].mxu0 }
 0x16e   :  { %338 = vst [vmem:[#allocation6] sm:$0xff] %v208_v20 }
 0x174   :  { %v414_v21 = vpop.f32.mrb[2].mxu0 }
 0x175   :  { %341 = vst [vmem:[#allocation6 + $0x18] sm:$0xff] %v414_v21  ;;  %v218_v22 = vpop.f32.mrb[3].mxu0 }
 0x176   :  { %340 = vst [vmem:[#allocation6 + $0x10] sm:$0xff] %v218_v22 }
 0x17c   :  { %v417_v23 = vpop.f32.mrb[4].mxu0 }
 0x17d   :  { %343 = vst [vmem:[#allocation6 + $0x28] sm:$0xff] %v417_v23  ;;  %v228_v24 = vpop.f32.mrb[5].mxu0 }
 0x17e   :  { %342 = vst [vmem:[#allocation6 + $0x20] sm:$0xff] %v228_v24 }
 0x184   :  { %v420_v25 = vpop.f32.mrb[6].mxu0 }
 0x185   :  { %345 = vst [vmem:[#allocation6 + $0x38] sm:$0xff] %v420_v25  ;;  %v238_v26 = vpop.f32.mrb[7].mxu0 }
 0x186   :  { %344 = vst [vmem:[#allocation6 + $0x30] sm:$0xff] %v238_v26 }
 0x18c   :  { %v423_v27 = vpop.f32.mrb[0].mxu1 }
 0x18d   :  { %347 = vst [vmem:[#allocation6 + $0x48] sm:$0xff] %v423_v27  ;;  %v248_v28 = vpop.f32.mrb[1].mxu1 }
 0x18e   :  { %346 = vst [vmem:[#allocation6 + $0x40] sm:$0xff] %v248_v28 }
 0x194   :  { %v426_v29 = vpop.f32.mrb[2].mxu1 }
 0x195   :  { %349 = vst [vmem:[#allocation6 + $0x58] sm:$0xff] %v426_v29  ;;  %v258_v30 = vpop.f32.mrb[3].mxu1 }
 0x196   :  { %348 = vst [vmem:[#allocation6 + $0x50] sm:$0xff] %v258_v30 }
 0x19c   :  { %v429_v31 = vpop.f32.mrb[4].mxu1 }
 0x19d   :  { %351 = vst [vmem:[#allocation6 + $0x68] sm:$0xff] %v429_v31  ;;  %v268_v32 = vpop.f32.mrb[5].mxu1 }
 0x19e   :  { %350 = vst [vmem:[#allocation6 + $0x60] sm:$0xff] %v268_v32 }
 0x1a4   :  { %v432_v33 = vpop.f32.mrb[6].mxu1 }
 0x1a5   :  { %353 = vst [vmem:[#allocation6 + $0x78] sm:$0xff] %v432_v33  ;;  %v278_v34 = vpop.f32.mrb[7].mxu1 }
 0x1a6   :  { %352 = vst [vmem:[#allocation6 + $0x70] sm:$0xff] %v278_v34 }
 0x1a7   :  { %477 = shalt.err (!%p474_p12)
}
 0x1a8   :  { %s478_s24 = scalar_lea.hbm %s553_s1, 2048 }
 0x1a9   :  { %p479_p13 = scmp.ne.s32.totalorder %s553_s1, %s478_s24  ;;  %p482_p0 = scmp.lt.u32.totalorder %s478_s24, %s553_s1 }
 0x1ab   :  { %p484_p1 = pnand %p482_p0, %p479_p13 }
 0x1ad   :  { %487 = shalt.err (!%p484_p1)
}
 0x1ae   :  { %365 = dma.vmem_to_hbm [thread:$0]  %s360_s20, 2048, %s553_s1, [#allocation5], %s493_s16, %s493_s16, %s494_s17  }
 0x1af   :  { %490 = dma.done.wait [#allocation5], 2048  }
 0x1b0   :  { %491 = vsyncadd [#allocation5], 4294965248 }
 0x1b1   :  { %369 = vsyncpa [#allocation4], 1 }
 0x1b2   :  { %370 = vsyncpa [#allocation5], 1 }

</bundles_post_ra>
